<compile_context>
chip_gen: v7x
topology: tpu7x:2x2x1
jax: 0.10.0
libtpu: 0.0.40
codegen_flags: <defaults>
</compile_context>

<pallas_src>
import jax
import jax.numpy as jnp
from jax.experimental import pallas as pl
from jax.experimental.pallas import tpu as pltpu


def _round_up(a, b):
    return ((a + b - 1) // b) * b


def _cdiv(a, b):
    return (a + b - 1) // b


def _pick_bn(cout_p, candidates=(512, 384, 256, 128)):
    """Largest lane-aligned N tile that exactly divides the padded C_out."""
    for c in candidates:
        if c <= cout_p and cout_p % c == 0:
            return c
    return 128


def _matmul_bias_kernel(x_ref, w_ref, b_ref, o_ref, acc_ref):
    """One (bm, bn) output tile, accumulating over the K (last) grid axis.

    x_ref:   (bm, bk)  activation tile (bf16 by default)
    w_ref:   (bk, bn)  weight tile, pre-transposed to (C_in, C_out) layout
    b_ref:   (1,  bn)  f32 bias tile
    o_ref:   (bm, bn)  output tile (resident across the K axis)
    acc_ref: (bm, bn)  f32 VMEM accumulator scratch
    """
    k = pl.program_id(2)

    @pl.when(k == 0)
    def _():
        acc_ref[...] = jnp.zeros_like(acc_ref)

    # Plain (bm,bk)@(bk,bn) on the MXU; bf16 in, f32 accumulation out.
    acc_ref[...] += jnp.dot(x_ref[...], w_ref[...],
                            preferred_element_type=jnp.float32)

    @pl.when(k == pl.num_programs(2) - 1)
    def _():
        o_ref[...] = (acc_ref[...] + b_ref[...].astype(jnp.float32)).astype(
            o_ref.dtype)


def my_conv_linear_forward(x, weight, bias, *, tm=256, tk_bf16=2048,
                           tk_f32=1024, use_bf16=True,
                           small_footprint_bytes=2 << 20):
    """x: (N, C_in); weight: (C_out, C_in, 1, 1); bias: (C_out,).

    Returns (N, C_out), matching MyConvLinear.forward's default path.
    """
    n, c_in = x.shape
    c_out = weight.shape[0]
    out_dtype = x.dtype

    compute_dtype = jnp.bfloat16 if use_bf16 else x.dtype
    itemsize = jnp.dtype(compute_dtype).itemsize
    out_itemsize = jnp.dtype(out_dtype).itemsize

    # One-time (C_out, C_in, 1, 1) -> (C_in, C_out) transpose fused with the
    # compute-dtype cast: amortized over every reuse of each weight tile.
    w2d = weight.reshape(c_out, c_in).T.astype(compute_dtype)
    b2d = bias.reshape(1, c_out).astype(jnp.float32)
    x_c = x.astype(compute_dtype)

    # Rough whole-problem resident footprint (double-buffered inputs + f32
    # acc + double-buffered f32 output).
    footprint = (2 * itemsize * (n * c_in + c_in * c_out)
                 + 4 * c_out + (1 + 2) * 4 * n * c_out)
    lane_dense_out = (c_out % 128 == 0)
    tiny_out = n * c_out * out_itemsize <= (256 << 10)

    if footprint <= small_footprint_bytes and (lane_dense_out or tiny_out):
        # Single-block fast path: no padding, whole problem resident, 1 step.
        bm, bk, bn = n, c_in, c_out
        n_p, cin_p, cout_p = n, c_in, c_out
    else:
        tk = tk_bf16 if compute_dtype == jnp.bfloat16 else tk_f32
        n_8 = _round_up(n, 8)
        cout_p = _round_up(c_out, 128)
        cin_128 = _round_up(c_in, 128)

        bn = _pick_bn(cout_p)

        # K tile: single step if C_in fits, else equal 128-aligned chunks.
        nk = _cdiv(cin_128, tk)
        bk = _round_up(_cdiv(cin_128, nk), 128)
        cin_p = bk * nk

        bm = min(tm, n_8)
        n_p = _round_up(n_8, bm)
        # Keep >= 2 independent (M, N) blocks so both v7x TensorCores (and
        # megacore scheduling on v5e/v6e) get work, unless N is tiny.
        if (n_p // bm) * (cout_p // bn) < 2 and n_8 > 8:
            bm = _round_up(_cdiv(n_8, 2), 8)
            n_p = _round_up(n_8, bm)

    # Only pad dims that actually need it (avoid extra HBM passes).
    x_p = x_c if (n_p == n and cin_p == c_in) else jnp.pad(
        x_c, ((0, n_p - n), (0, cin_p - c_in)))
    w_p = w2d if (cin_p == c_in and cout_p == c_out) else jnp.pad(
        w2d, ((0, cin_p - c_in), (0, cout_p - c_out)))
    b_p = b2d if cout_p == c_out else jnp.pad(
        b2d, ((0, 0), (0, cout_p - c_out)))

    grid = (n_p // bm, cout_p // bn, cin_p // bk)

    # Per-step VMEM budget: double-buffered x/w/bias tiles + f32 acc scratch
    # + double-buffered output tile. Only pass an explicit limit if we get
    # close to the scoped defaults (16 MiB v5e / 32 MiB v6e+v7x); cap well
    # under v7x's 64 MiB physical VMEM.
    step_bytes = (2 * itemsize * (bm * bk + bk * bn) + 2 * 4 * bn
                  + 4 * bm * bn + 2 * out_itemsize * bm * bn)
    compiler_kwargs = dict(
        dimension_semantics=("parallel", "parallel", "arbitrary"))
    if step_bytes > (12 << 20):
        compiler_kwargs["vmem_limit_bytes"] = min(
            int(step_bytes * 1.5) + (4 << 20), 60 << 20)

    out = pl.pallas_call(
        _matmul_bias_kernel,
        out_shape=jax.ShapeDtypeStruct((n_p, cout_p), out_dtype),
        grid_spec=pltpu.PrefetchScalarGridSpec(
            num_scalar_prefetch=0,
            grid=grid,
            in_specs=[
                pl.BlockSpec((bm, bk), lambda i, j, k: (i, k)),
                pl.BlockSpec((bk, bn), lambda i, j, k: (k, j)),
                pl.BlockSpec((1, bn), lambda i, j, k: (0, j)),
            ],
            out_specs=pl.BlockSpec((bm, bn), lambda i, j, k: (i, j)),
            scratch_shapes=[pltpu.VMEM((bm, bn), jnp.float32)],
        ),
        compiler_params=pltpu.CompilerParams(**compiler_kwargs),
    )(x_p, w_p, b_p)

    if n_p != n or cout_p != c_out:
        out = out[:n, :c_out]
    return out


if __name__ == "__main__":
    key = jax.random.PRNGKey(0)
    k1, k2, k3, k4, k5, k6 = jax.random.split(key, 6)

    def bf16_ref(x, weight, bias):
        c_out, c_in = weight.shape[0], weight.shape[1]
        xb = x.astype(jnp.bfloat16)
        wb = weight.reshape(c_out, c_in).T.astype(jnp.bfloat16)
        return (jnp.dot(xb, wb, preferred_element_type=jnp.float32)
                + bias.astype(jnp.float32))

    # --- small module-like shapes (exercises the single-block fast path) ---
    N, C_IN, C_OUT = 8, 32, 64
    x = jax.random.normal(k1, (N, C_IN), dtype=jnp.float32)
    weight = jax.random.normal(k2, (C_OUT, C_IN, 1, 1), dtype=jnp.float32) * 0.05
    bias = jax.random.normal(k3, (C_OUT,), dtype=jnp.float32) * 0.05

    out = jax.block_until_ready(my_conv_linear_forward(x, weight, bias))
    assert out.shape == (N, C_OUT)
    ref_b = bf16_ref(x, weight, bias)
    ref_f = x @ weight.reshape(C_OUT, C_IN).T + bias
    assert jnp.allclose(out, ref_b, atol=1e-2, rtol=1e-2)
    assert jnp.allclose(out, ref_f, atol=5e-2, rtol=5e-2)

    # --- larger shapes (tiled path: bn=384 no C_out pad, bk=1024 single K) ---
    N2, C_IN2, C_OUT2 = 500, 1024, 384
    x2 = jax.random.normal(k4, (N2, C_IN2), dtype=jnp.float32)
    weight2 = jax.random.normal(k5, (C_OUT2, C_IN2, 1, 1), dtype=jnp.float32) * 0.02
    bias2 = jax.random.normal(k6, (C_OUT2,), dtype=jnp.float32) * 0.02

    out2 = jax.block_until_ready(my_conv_linear_forward(x2, weight2, bias2))
    assert out2.shape == (N2, C_OUT2)
    ref2_b = bf16_ref(x2, weight2, bias2)
    ref2_f = x2 @ weight2.reshape(C_OUT2, C_IN2).T + bias2
    assert jnp.allclose(out2, ref2_b, atol=2e-2, rtol=2e-2)
    assert jnp.allclose(out2, ref2_f, atol=1e-1, rtol=1e-1)

    print("KERNEL_OK")
</pallas_src>

<mosaic_0001>
module attributes {stable_mosaic.version = 11 : i64} {
  func.func @_matmul_bias_kernel(%arg0: i32, %arg1: i32, %arg2: i32, %arg3: memref<8x32xbf16, #tpu.memory_space<vmem>>, %arg4: memref<32x64xbf16, #tpu.memory_space<vmem>>, %arg5: memref<1x64xf32, #tpu.memory_space<vmem>>, %arg6: memref<8x64xf32, #tpu.memory_space<vmem>>, %arg7: memref<8x64xf32, #tpu.memory_space<vmem>>) attributes {dimension_semantics = [#tpu.dimension_semantics<parallel>, #tpu.dimension_semantics<parallel>, #tpu.dimension_semantics<arbitrary>], iteration_bounds = array<i64: 1, 1, 1>, scalar_prefetch = 0 : i64, scratch_operands = 1 : i64, tpu.core_type = #tpu.core_type<tc>, window_params = [{transform_indices = @transform_0, window_bounds = array<i64: 8, 32>}, {transform_indices = @transform_1, window_bounds = array<i64: 32, 64>}, {transform_indices = @transform_2, window_bounds = array<i64: 1, 64>}, {transform_indices = @transform_3, window_bounds = array<i64: 8, 64>}]} {
    %c0_i32 = arith.constant 0 : i32
    %0 = arith.cmpi eq, %arg2, %c0_i32 : i32
    %1 = arith.extui %0 : i1 to i32
    %c0_i32_0 = arith.constant 0 : i32
    %2 = arith.cmpi ne, %1, %c0_i32_0 : i32
    scf.if %2 {
      %cst_10 = arith.constant 0.000000e+00 : f32
      %12 = vector.broadcast %cst_10 : f32 to vector<8x64xf32>
      %c0_11 = arith.constant 0 : index
      %c0_12 = arith.constant 0 : index
      %13 = vector.load %arg7[%c0_11, %c0_12] : memref<8x64xf32, #tpu.memory_space<vmem>>, vector<8x64xf32>
      tpu.vector_store %arg7[%c0_11, %c0_12], %12 {strides = array<i32>} : memref<8x64xf32, #tpu.memory_space<vmem>>, vector<8x64xf32>,
    } else {
    }
    %c0 = arith.constant 0 : index
    %c0_1 = arith.constant 0 : index
    %3 = vector.load %arg7[%c0, %c0_1] : memref<8x64xf32, #tpu.memory_space<vmem>>, vector<8x64xf32>
    %c0_2 = arith.constant 0 : index
    %c0_3 = arith.constant 0 : index
    %4 = vector.load %arg3[%c0_2, %c0_3] : memref<8x32xbf16, #tpu.memory_space<vmem>>, vector<8x32xbf16>
    %c0_4 = arith.constant 0 : index
    %c0_5 = arith.constant 0 : index
    %5 = vector.load %arg4[%c0_4, %c0_5] : memref<32x64xbf16, #tpu.memory_space<vmem>>, vector<32x64xbf16>
    %cst = arith.constant dense<0.000000e+00> : vector<8x64xf32>
    %6 = tpu.matmul %4, %5, %cst {dimension_numbers = #tpu.dot_dimension_numbers<[1], [0], [0], [1], [0, 0, 1, 1], [], []>} : vector<8x32xbf16>, vector<32x64xbf16>, vector<8x64xf32> -> vector<8x64xf32>
    %7 = arith.addf %3, %6 : vector<8x64xf32>
    %c0_6 = arith.constant 0 : index
    %c0_7 = arith.constant 0 : index
    %8 = vector.load %arg7[%c0_6, %c0_7] : memref<8x64xf32, #tpu.memory_space<vmem>>, vector<8x64xf32>
    tpu.vector_store %arg7[%c0_6, %c0_7], %7 {strides = array<i32>} : memref<8x64xf32, #tpu.memory_space<vmem>>, vector<8x64xf32>,
    %c0_i32_8 = arith.constant 0 : i32
    %9 = arith.cmpi eq, %arg2, %c0_i32_8 : i32
    %10 = arith.extui %9 : i1 to i32
    %c0_i32_9 = arith.constant 0 : i32
    %11 = arith.cmpi ne, %10, %c0_i32_9 : i32
    scf.if %11 {
      %c0_10 = arith.constant 0 : index
      %c0_11 = arith.constant 0 : index
      %12 = vector.load %arg7[%c0_10, %c0_11] : memref<8x64xf32, #tpu.memory_space<vmem>>, vector<8x64xf32>
      %c0_12 = arith.constant 0 : index
      %c0_13 = arith.constant 0 : index
      %13 = vector.load %arg5[%c0_12, %c0_13] : memref<1x64xf32, #tpu.memory_space<vmem>>, vector<1x64xf32>
      %14 = vector.broadcast %13 : vector<1x64xf32> to vector<8x64xf32>
      %15 = arith.addf %12, %14 : vector<8x64xf32>
      %c0_14 = arith.constant 0 : index
      %c0_15 = arith.constant 0 : index
      %16 = vector.load %arg6[%c0_14, %c0_15] : memref<8x64xf32, #tpu.memory_space<vmem>>, vector<8x64xf32>
      tpu.vector_store %arg6[%c0_14, %c0_15], %15 {strides = array<i32>} : memref<8x64xf32, #tpu.memory_space<vmem>>, vector<8x64xf32>,
    } else {
    }
    return
  }
  func.func @transform_0(%arg0: i32, %arg1: i32, %arg2: i32) -> (i32, i32) {
    %c0_i32 = arith.constant 0 : i32
    return %arg0, %arg2 : i32, i32
  }
  func.func @transform_1(%arg0: i32, %arg1: i32, %arg2: i32) -> (i32, i32) {
    %c0_i32 = arith.constant 0 : i32
    return %arg2, %arg1 : i32, i32
  }
  func.func @transform_2(%arg0: i32, %arg1: i32, %arg2: i32) -> (i32, i32) {
    %c0_i32 = arith.constant 0 : i32
    %c0_i32_0 = arith.constant 0 : i32
    return %c0_i32, %arg1 : i32, i32
  }
  func.func @transform_3(%arg0: i32, %arg1: i32, %arg2: i32) -> (i32, i32) {
    %c0_i32 = arith.constant 0 : i32
    return %arg0, %arg1 : i32, i32
  }
}

</mosaic_0001>

<bundles_post_ra>
// kernel: tpu_custom_call.1
= control target key start
LH: loop header
LB: loop body
LE: loop exit
PB: predicated region body
PF: predicated region fallthrough
CT: control target
= control target key end

     0   :  { %8 = vsyncpa [#allocation4], 0  ;;  %s314_s0 = inlined_call_operand.hbm [shape: bf16[8,32], index: 0, kind: input, shape index: {}]   ;;  %s315_s1 = inlined_call_operand.hbm [shape: bf16[32,64], index: 1, kind: input, shape index: {}]   ;;  %s316_s2 = inlined_call_operand.vmem [shape: f32[1,64], index: 2, kind: input, shape index: {}]   ;;  %s317_s3 = inlined_call_operand.hbm [shape: f32[8,64], index: 3, kind: output, shape index: {}]  }
   0x1   :  { %9 = vsyncpa [#allocation7], 0 }
   0x2   :  { %10 = vsyncpa [#allocation5], 0  ;;  %s238_s12 = smov [#allocation3]   ;;  %s239_s14 = smov [#allocation6]  }
   0x3   :  { %s17_s13 = sshll.u32 %s238_s12, 4  ;;  %s26_s15 = sshll.u32 %s239_s14, 4  ;;  %s18_s13 = int_to_ptr.vmem [resolvable:$true] %s17_s13  ;;  %s265_s15 = int_to_ptr.vmem [resolvable:$true] %s26_s15 }
   0x4   :  { %s166_s18 = scalar_lea.hbm %s314_s0, 64 }
   0x5   :  { %p167_p0 = scmp.ne.s32.totalorder %s314_s0, %s166_s18  ;;  %p170_p1 = scmp.lt.u32.totalorder %s166_s18, %s314_s0 }
   0x7   :  { %p172_p2 = pnand %p170_p1, %p167_p0 }
   0x9   :  { %175 = shalt.err (!%p172_p2)
}
   0xa   :  { %s176_s23 = scalar_lea.vmem %s18_s13, 64  ;;  %p181_p4 = scmp.lt.s32.totalorder %s18_s13, %s18_s13 }
   0xb   :  { %p177_p3 = scmp.ne.s32.totalorder %s18_s13, %s176_s23  ;;  %p182_p5 = scmp.lt.s32.totalorder %s176_s23, %s176_s23 }
   0xd   :  { %p183_p6 = por %p182_p5, %p181_p4 }
   0xf   :  { %p184_p7 = pnand %p183_p6, %p177_p3 }
  0x11   :  { %187 = shalt.err (!%p184_p7)
}
  0x12   :  { %20 = dma.hbm_to_vmem [thread:$0]  %s314_s0, 64, %s18_s13, [#allocation4]  }
  0x13   :  { %s188_s28 = scalar_lea.hbm %s315_s1, 256 }
  0x14   :  { %p189_p8 = scmp.ne.s32.totalorder %s315_s1, %s188_s28  ;;  %p192_p9 = scmp.lt.u32.totalorder %s188_s28, %s315_s1 }
  0x16   :  { %p194_p10 = pnand %p192_p9, %p189_p8 }
  0x18   :  { %197 = shalt.err (!%p194_p10)
}
  0x19   :  { %s198_s6 = scalar_lea.vmem %s265_s15, 256  ;;  %p203_p12 = scmp.lt.s32.totalorder %s265_s15, %s265_s15 }
  0x1a   :  { %p199_p11 = scmp.ne.s32.totalorder %s265_s15, %s198_s6  ;;  %p204_p13 = scmp.lt.s32.totalorder %s198_s6, %s198_s6 }
  0x1c   :  { %p205_p0 = por %p204_p13, %p203_p12 }
  0x1e   :  { %p206_p1 = pnand %p205_p0, %p199_p11 }
  0x20   :  { %209 = shalt.err (!%p206_p1)
}
  0x21   :  { %s240_s0 = smov 64   ;;  %s241_s7 = smov 4  }
  0x22   :  { %32 = dma.hbm_to_vmem [thread:$0]  %s315_s1, 256, %s265_s15, [#allocation7], %s240_s0, %s240_s0, %s241_s7  }
  0x23   :  { %232 = dma.done.wait [#allocation4], 64  }
  0x24   :  { %233 = vsyncadd [#allocation4], 4294967232 }
  0x25   :  { %234 = dma.done.wait [#allocation7], 256  }
  0x26   :  { %235 = vsyncadd [#allocation7], 4294967040  ;;  %vm46_vm0 = vcmask 523264   ;;  %v242_v0 = vmov 0.0   ;;  %vm243_vm1 = vmmov 0   ;;  %v164_v1 = vld [vmem:[#allocation6] sm:$0xff]  }
  0x27   :  { %149 = vmatprep.subr.bf16.mxu0 %v242_v0  ;;  %153 = vmatprep.mubr.msk.bf16.mxu0 %vm243_vm1, %v242_v0  ;;  %47 = vst.msk [vmem:[#allocation2] sm:$0xff] %vm46_vm0, %v242_v0  ;;  %v165_v2 = vld [vmem:[#allocation6 + $0x8] sm:$0xff]   ;;  %v49_v3 = vld [vmem:[#allocation3] sm:$0xf]  ;;  %vm66_vm2 = vcmask 261120   ;;  %s244_s11 = smov [#allocation8]  }
  0x28   :  { %150 = vmatpush3.bf16.msra.mxu0 %v164_v1  ;;  %v145_v10 = vld [vmem:[%s316_s2] ss:$0 sm:$0xff]  ;;  %s132_s12 = sshll.u32 %s244_s11, 4  ;;  %s133_s12 = int_to_ptr.vmem [resolvable:$true] %s132_s12 }
  0x29   :  { %151 = vmatprep.subr.bf16.mxu0 %v242_v0  ;;  %s210_s13 = scalar_lea.vmem %s133_s12, 128  ;;  %p215_p3 = scmp.lt.s32.totalorder %s133_s12, %s133_s12 }
  0x2a   :  { %p211_p2 = scmp.ne.s32.totalorder %s133_s12, %s210_s13  ;;  %p216_p4 = scmp.lt.s32.totalorder %s210_s13, %s210_s13 }
  0x2c   :  { %152 = vmatpush3.bf16.msra.mxu0 %v165_v2  ;;  %p217_p5 = por %p216_p4, %p215_p3 }
  0x2e   :  { %v48_v4 = vld [vmem:[#allocation2] sm:$0xff]  ;;  %p218_p6 = pnand %p217_p5, %p211_p2 }
  0x2f   :  { %154 = vmatmul.mubr.msk.bf16.vlgmr.msra.gmra.mrb[0].mxu0 %vm66_vm2, %v49_v3 }
 0x102   :  { %v104_v5 = vpop.f32.mrb[0].mxu0 }
 0x103   :  { %v110_v6 = vadd.f32 %v104_v5, %v48_v4  ;;  %v155_v7 = vpop.f32.mrb[1].mxu0 }
 0x104   :  { %v107_v8 = vpop.f32.mrb[2].mxu0 }
 0x105   :  { %112 = vst.msk [vmem:[#allocation2] sm:$0xff] %vm46_vm0, %v110_v6  ;;  %v156_v9 = vpop.f32.mrb[3].mxu0 }
 0x10c   :  { %v116_v11 = vld [vmem:[#allocation2] sm:$0xff] }
 0x10d   :  { %v124_v12 = vadd.f32 %v145_v10, %v116_v11 }
 0x10f   :  { %125 = vst.msk [vmem:[#allocation8] sm:$0xff] %vm46_vm0, %v124_v12 }
 0x110   :  { %221 = shalt.err (!%p218_p6)
}
 0x111   :  { %s222_s16 = scalar_lea.hbm %s317_s3, 128 }
 0x112   :  { %p223_p7 = scmp.ne.s32.totalorder %s317_s3, %s222_s16  ;;  %p226_p8 = scmp.lt.u32.totalorder %s222_s16, %s317_s3 }
 0x114   :  { %p228_p9 = pnand %p226_p8, %p223_p7 }
 0x116   :  { %231 = shalt.err (!%p228_p9)
}
 0x117   :  { %135 = dma.vmem_to_hbm [thread:$0]  %s133_s12, 128, %s317_s3, [#allocation5]  }
 0x118   :  { %236 = dma.done.wait [#allocation5], 128  }
 0x119   :  { %237 = vsyncadd [#allocation5], 4294967168 }
 0x11a   :  { %139 = vsyncpa [#allocation4], 1 }
 0x11b   :  { %140 = vsyncpa [#allocation7], 1 }
 0x11c   :  { %141 = vsyncpa [#allocation5], 1 }

</bundles_post_ra>
